<compile_context>
chip_gen: v5e
topology: v5e:2x2
jax: 0.10.0
libtpu: 0.0.40
codegen_flags: <defaults>
</compile_context>

<pallas_src>
import functools

import jax
import jax.numpy as jnp
from jax.experimental import pallas as pl
from jax.experimental.pallas import tpu as pltpu


def _temporal_shift_kernel(x_ref, o_ref, *, fold):
    """x_ref / o_ref: (1, c_block, T, F) slab for one (batch, channel-group).

    Only the first channel group (cg == 0) contains the two shifted folds;
    every other channel group is a pure pass-through copy.
    """
    _, c_block, T, F = x_ref.shape
    cg = pl.program_id(1)

    # Static (Python-level) channel-range bounds inside the first block.
    f0_end = min(fold, c_block)            # end of the backward-shifted fold
    f1_end = min(2 * fold, c_block)        # end of the forward-shifted fold

    @pl.when(cg == 0)
    def _shift_block():
        if f0_end > 0:
            # fold0: out[t] = x[t + 1], zero at the last frame.
            if T > 1:
                o_ref[:, 0:f0_end, 0:T - 1, :] = x_ref[:, 0:f0_end, 1:T, :]
            o_ref[:, 0:f0_end, T - 1:T, :] = jnp.zeros(
                (1, f0_end, 1, F), dtype=o_ref.dtype)
        if f1_end > f0_end:
            # fold1: out[t] = x[t - 1], zero at the first frame.
            if T > 1:
                o_ref[:, f0_end:f1_end, 1:T, :] = x_ref[:, f0_end:f1_end, 0:T - 1, :]
            o_ref[:, f0_end:f1_end, 0:1, :] = jnp.zeros(
                (1, f1_end - f0_end, 1, F), dtype=o_ref.dtype)
        if f1_end < c_block:
            # Untouched channels inside the first block: plain copy.
            o_ref[:, f1_end:c_block, :, :] = x_ref[:, f1_end:c_block, :, :]

    @pl.when(cg != 0)
    def _copy_block():
        # Channel groups past the first hold no shifted channels: pure copy.
        o_ref[...] = x_ref[...]


def temporal_shift(x, shift_div=8, c_block=None,
                   block_bytes_target=2 * 1024 * 1024):
    """x: (B, C, T, F) -> (B, C, T, F), matching the PyTorch TemporalShift."""
    B, C, T, F = x.shape
    fold = C // shift_div

    if c_block is None:
        bytes_per_channel = T * F * jnp.dtype(x.dtype).itemsize
        c_block = max(1, block_bytes_target // max(1, bytes_per_channel))
    # The first channel block must contain both shifted folds.
    min_block = min(2 * fold, C) if fold > 0 else 1
    c_block = min(C, max(int(c_block), min_block, 1))
    num_cg = pl.cdiv(C, c_block)

    kernel = functools.partial(_temporal_shift_kernel, fold=fold)

    return pl.pallas_call(
        kernel,
        out_shape=jax.ShapeDtypeStruct((B, C, T, F), x.dtype),
        grid=(B, num_cg),
        in_specs=[
            pl.BlockSpec((1, c_block, T, F), lambda b, cg: (b, cg, 0, 0)),
        ],
        out_specs=pl.BlockSpec((1, c_block, T, F), lambda b, cg: (b, cg, 0, 0)),
        compiler_params=pltpu.CompilerParams(
            dimension_semantics=("parallel", "parallel")),
    )(x)


def _temporal_shift_ref(x, shift_div=8):
    """Pure-JAX reference mirroring the PyTorch module (permutes cancel)."""
    B, C, T, F = x.shape
    fold = C // shift_div
    out = jnp.zeros_like(x)
    out = out.at[:, :fold, :-1, :].set(x[:, :fold, 1:, :])
    out = out.at[:, fold:2 * fold, 1:, :].set(x[:, fold:2 * fold, :-1, :])
    out = out.at[:, 2 * fold:, :, :].set(x[:, 2 * fold:, :, :])
    return out


if __name__ == "__main__":
    key = jax.random.PRNGKey(0)
    B, C, T, F = 2, 16, 8, 16  # fold = C // 8 = 2
    x = jax.random.normal(key, (B, C, T, F), dtype=jnp.float32)

    out = jax.block_until_ready(temporal_shift(x, shift_div=8))

    ref = _temporal_shift_ref(x, shift_div=8)
    assert out.shape == (B, C, T, F)
    assert jnp.allclose(out, ref, atol=1e-6, rtol=1e-6)

    print("KERNEL_OK")
</pallas_src>

<mosaic_0001>
module attributes {stable_mosaic.version = 11 : i64} {
  func.func @_temporal_shift_kernel(%arg0: i32, %arg1: i32, %arg2: memref<1x16x8x16xf32, #tpu.memory_space<vmem>>, %arg3: memref<1x16x8x16xf32, #tpu.memory_space<vmem>>) attributes {dimension_semantics = [#tpu.dimension_semantics<parallel>, #tpu.dimension_semantics<parallel>], iteration_bounds = array<i64: 2, 1>, scalar_prefetch = 0 : i64, scratch_operands = 0 : i64, tpu.core_type = #tpu.core_type<tc>, window_params = [{transform_indices = @transform_0, window_bounds = array<i64: 1, 16, 8, 16>}, {transform_indices = @transform_1, window_bounds = array<i64: 1, 16, 8, 16>}]} {
    %c0_i32 = arith.constant 0 : i32
    %0 = arith.cmpi eq, %arg1, %c0_i32 : i32
    %1 = arith.extui %0 : i1 to i32
    %c0_i32_0 = arith.constant 0 : i32
    %2 = arith.cmpi ne, %1, %c0_i32_0 : i32
    scf.if %2 {
      %c0 = arith.constant 0 : index
      %c0_3 = arith.constant 0 : index
      %c1 = arith.constant 1 : index
      %c0_4 = arith.constant 0 : index
      %6 = vector.load %arg2[%c0, %c0_3, %c1, %c0_4] : memref<1x16x8x16xf32, #tpu.memory_space<vmem>>, vector<1x2x7x16xf32>
      %c0_5 = arith.constant 0 : index
      %c0_6 = arith.constant 0 : index
      %c0_7 = arith.constant 0 : index
      %c0_8 = arith.constant 0 : index
      %7 = vector.load %arg3[%c0_5, %c0_6, %c0_7, %c0_8] : memref<1x16x8x16xf32, #tpu.memory_space<vmem>>, vector<1x2x7x16xf32>
      tpu.vector_store %arg3[%c0_5, %c0_6, %c0_7, %c0_8], %6 {strides = array<i32>} : memref<1x16x8x16xf32, #tpu.memory_space<vmem>>, vector<1x2x7x16xf32>,
      %cst = arith.constant 0.000000e+00 : f32
      %8 = vector.broadcast %cst : f32 to vector<1x2x1x16xf32>
      %c0_9 = arith.constant 0 : index
      %c0_10 = arith.constant 0 : index
      %c7 = arith.constant 7 : index
      %c0_11 = arith.constant 0 : index
      %9 = vector.load %arg3[%c0_9, %c0_10, %c7, %c0_11] : memref<1x16x8x16xf32, #tpu.memory_space<vmem>>, vector<1x2x1x16xf32>
      tpu.vector_store %arg3[%c0_9, %c0_10, %c7, %c0_11], %8 {strides = array<i32>} : memref<1x16x8x16xf32, #tpu.memory_space<vmem>>, vector<1x2x1x16xf32>,
      %c0_12 = arith.constant 0 : index
      %c2 = arith.constant 2 : index
      %c0_13 = arith.constant 0 : index
      %c0_14 = arith.constant 0 : index
      %10 = vector.load %arg2[%c0_12, %c2, %c0_13, %c0_14] : memref<1x16x8x16xf32, #tpu.memory_space<vmem>>, vector<1x2x7x16xf32>
      %c0_15 = arith.constant 0 : index
      %c2_16 = arith.constant 2 : index
      %c1_17 = arith.constant 1 : index
      %c0_18 = arith.constant 0 : index
      %11 = vector.load %arg3[%c0_15, %c2_16, %c1_17, %c0_18] : memref<1x16x8x16xf32, #tpu.memory_space<vmem>>, vector<1x2x7x16xf32>
      tpu.vector_store %arg3[%c0_15, %c2_16, %c1_17, %c0_18], %10 {strides = array<i32>} : memref<1x16x8x16xf32, #tpu.memory_space<vmem>>, vector<1x2x7x16xf32>,
      %cst_19 = arith.constant 0.000000e+00 : f32
      %12 = vector.broadcast %cst_19 : f32 to vector<1x2x1x16xf32>
      %c0_20 = arith.constant 0 : index
      %c2_21 = arith.constant 2 : index
      %c0_22 = arith.constant 0 : index
      %c0_23 = arith.constant 0 : index
      %13 = vector.load %arg3[%c0_20, %c2_21, %c0_22, %c0_23] : memref<1x16x8x16xf32, #tpu.memory_space<vmem>>, vector<1x2x1x16xf32>
      tpu.vector_store %arg3[%c0_20, %c2_21, %c0_22, %c0_23], %12 {strides = array<i32>} : memref<1x16x8x16xf32, #tpu.memory_space<vmem>>, vector<1x2x1x16xf32>,
      %c0_24 = arith.constant 0 : index
      %c4 = arith.constant 4 : index
      %c0_25 = arith.constant 0 : index
      %c0_26 = arith.constant 0 : index
      %14 = vector.load %arg2[%c0_24, %c4, %c0_25, %c0_26] : memref<1x16x8x16xf32, #tpu.memory_space<vmem>>, vector<1x12x8x16xf32>
      %c0_27 = arith.constant 0 : index
      %c4_28 = arith.constant 4 : index
      %c0_29 = arith.constant 0 : index
      %c0_30 = arith.constant 0 : index
      %15 = vector.load %arg3[%c0_27, %c4_28, %c0_29, %c0_30] : memref<1x16x8x16xf32, #tpu.memory_space<vmem>>, vector<1x12x8x16xf32>
      tpu.vector_store %arg3[%c0_27, %c4_28, %c0_29, %c0_30], %14 {strides = array<i32>} : memref<1x16x8x16xf32, #tpu.memory_space<vmem>>, vector<1x12x8x16xf32>,
    } else {
    }
    %c0_i32_1 = arith.constant 0 : i32
    %3 = arith.cmpi ne, %arg1, %c0_i32_1 : i32
    %4 = arith.extui %3 : i1 to i32
    %c0_i32_2 = arith.constant 0 : i32
    %5 = arith.cmpi ne, %4, %c0_i32_2 : i32
    scf.if %5 {
      %c0 = arith.constant 0 : index
      %c0_3 = arith.constant 0 : index
      %c0_4 = arith.constant 0 : index
      %c0_5 = arith.constant 0 : index
      %6 = vector.load %arg2[%c0, %c0_3, %c0_4, %c0_5] : memref<1x16x8x16xf32, #tpu.memory_space<vmem>>, vector<1x16x8x16xf32>
      %c0_6 = arith.constant 0 : index
      %c0_7 = arith.constant 0 : index
      %c0_8 = arith.constant 0 : index
      %c0_9 = arith.constant 0 : index
      %7 = vector.load %arg3[%c0_6, %c0_7, %c0_8, %c0_9] : memref<1x16x8x16xf32, #tpu.memory_space<vmem>>, vector<1x16x8x16xf32>
      tpu.vector_store %arg3[%c0_6, %c0_7, %c0_8, %c0_9], %6 {strides = array<i32>} : memref<1x16x8x16xf32, #tpu.memory_space<vmem>>, vector<1x16x8x16xf32>,
    } else {
    }
    return
  }
  func.func @transform_0(%arg0: i32, %arg1: i32) -> (i32, i32, i32, i32) {
    %c0_i32 = arith.constant 0 : i32
    %c0_i32_0 = arith.constant 0 : i32
    %c0_i32_1 = arith.constant 0 : i32
    return %arg0, %arg1, %c0_i32, %c0_i32_0 : i32, i32, i32, i32
  }
  func.func @transform_1(%arg0: i32, %arg1: i32) -> (i32, i32, i32, i32) {
    %c0_i32 = arith.constant 0 : i32
    %c0_i32_0 = arith.constant 0 : i32
    %c0_i32_1 = arith.constant 0 : i32
    return %arg0, %arg1, %c0_i32, %c0_i32_0 : i32, i32, i32, i32
  }
}

</mosaic_0001>

<bundles_post_ra>
// kernel: tpu_custom_call.1
= control target key start
LH: loop header
LB: loop body
LE: loop exit
PB: predicated region body
PF: predicated region fallthrough
CT: control target
= control target key end

     0   :  { %6 = vsyncpa [#allocation3], 0  ;;  %s762_s0 = inlined_call_operand.hbm [shape: f32[2,16,8,16], index: 0, kind: input, shape index: {}]   ;;  %s763_s1 = inlined_call_operand.hbm [shape: f32[2,16,8,16], index: 1, kind: output, shape index: {}]  }
   0x1   :  { %8 = vsyncpa [#allocation3 + $0x1], 0 }
   0x2   :  { %9 = vsyncpa [#allocation4], 0 }
   0x3   :  { %11 = vsyncpa [#allocation4 + $0x1], 0  ;;  %s589_s6 = smov 0   ;;  %s591_s7 = smov 0  }
   0x4   :  { %s593_s8 = smov 0   ;;  %s595_s9 = smov 0  }
   0x5   :  { %s597_s10 = smov 0   ;;  %s599_s11 = smov 0  }
   0x6 LB: > { %s346_s12 = sadd.s32 4294967295, %s572_s11   ;;  %s347_s13 = sadd.s32 4294967294, %s572_s11   ;;  %s572_s11 = sphi %s599_s11, %s17_s11   ;;  %s568_s10 = sphi %s597_s10, %s772_s10   ;;  %s564_s9 = sphi %s595_s9, %s771_s9   ;;  %s560_s8 = sphi %s593_s8, %s770_s8   ;;  %s556_s7 = sphi %s591_s7, %s769_s7   ;;  %s552_s6 = sphi %s589_s6, %s768_s6  }
   0x7   : > { %s29_s14 = sadd.s32 1, %s568_s10  ;;  %s38_s15 = sadd.s32 1, %s560_s8 }
   0x8   : > { %p31_p0 = scmp.ge.s32.totalorder %s29_s14, 2  ;;  %p45_p1 = scmp.ne.s32.totalorder %s560_s8, %s556_s7 }
   0x9   : > { %p46_p2 = scmp.eq.s32.totalorder %s572_s11, 0  ;;  %p51_p3 = scmp.ne.s32.totalorder %s556_s7, %s552_s6 }
   0xa   : > { %s774_s14 = smov (%p31_p0, %s29_s14), 0  ;;  %p52_p5 = scmp.eq.s32.totalorder %s346_s12, 0 }
   0xb   : > { %p630_p4 = por %p46_p2, %p45_p1  ;;  %s33_s17 = ssub.s32 %s568_s10, %s774_s14 }
   0xc   : > { %p77_p6 = scmp.eq.s32.totalorder %s346_s12, 1  ;;  %p36_p7 = scmp.eq.s32.totalorder %s33_s17, 0 }
   0xd   : > { %p636_p8 = por %p52_p5, %p51_p3  ;;  %p83_p10 = scmp.eq.s32.totalorder %s347_s13, 1 }
   0xe   : > { %p640_p9 = por %p77_p6, %p45_p1  ;;  %p349_p12 = scmp.ge.s32.totalorder %s572_s11, 2 }
   0xf   : > { %s645_s20 = scalar_select %p36_p7, %s560_s8, %s38_s15  }
  0x10   : > { %p647_p11 = por %p83_p10, %p51_p3  ;;  %p405_p13 = scmp.lt.s32.totalorder %s572_s11, 2 }
  0x11   : > { %s103_s22 = sand.u32 1, %s560_s8   ;;  %s391_s24 = sshll.u32 %s568_s10, 7 }
  0x12   : > { %s350_s23 = sshll.u32 %s103_s22, 7  ;;  %s114_s27 = scalar_lea.hbm %s762_s0, %s391_s24 }
  0x13   : > { %s107_s28 = scalar_lea.vmem [#allocation2], %s350_s23  ;;  %s115_s30 = sshll.u32 %s114_s27, 4  ;;  %s116_s30 = int_to_ptr.hbm [resolvable:$true] %s115_s30 }
  0x14   : > { %s117_s29 = sshll.u32 %s107_s28, 4  ;;  %p398_p0 = pnand %p405_p13, %p630_p4  ;;  %s118_s29 = int_to_ptr.vmem [resolvable:$true] %s117_s29 }
  0x15   : > { %p353_p1 = scmp.ge.s32.totalorder %s572_s11, 1  ;;  %s104_s2 = scalar_lea.sflag [#allocation3], %s103_s22 }
  0x16   : > { %s574_s3 = smov 128   ;;  %s575_s4 = smov 8  }
  0x17   : > { %400 = dma.hbm_to_vmem [thread:$0]  (!%p398_p0), %s116_s30, 2048, %s118_s29, %s104_s2, %s574_s3, %s574_s3, %s575_s4  }
  0x18   : > { %p125_p2 = scmp.lt.s32.totalorder %s572_s11, 3 }
  0x1a   : > { %p126_p3 = pnand %p353_p1, %p125_p2 }
  0x1b   : > { %s663_s5 = sand.u32 (!%p126_p3), 1, %s556_s7  }
  0x1c   : > { %129 = sbr.rel (%p126_p3) target bundleno = 58 (0x3a), region = 24  ;;  %s354_s12 = sshll.u32 (!%p126_p3), %s663_s5, 7 }
  0x1d   : > { %s132_s13 = scalar_lea.sflag (!%p126_p3), [#allocation3], %s663_s5  ;;  %s667_s15 = scalar_lea.vmem (!%p126_p3), [#allocation2], %s354_s12 }
  0x21   : > { %543 = dma.done.wait (%p636_p8), %s132_s13, 2048  }
  0x22   : > { %545 = vsyncadd (%p636_p8), %s132_s13, 4294965248  ;;  %vm166_vm0 = vcmask 122880   ;;  %s673_s16 = scalar_lea.vmem [#allocation5], %s354_s12  ;;  %v576_v0 = vmov 0.0   ;;  %vm163_vm1 = vcmask 129024   ;;  %v362_v5 = vld [vmem:[%s667_s15 + $0x20] sm:$0xff] }
  0x23   : > { %167 = vst.msk [vmem:[%s673_s16 + $0x7] sm:$0x1] %vm166_vm0, %v576_v0  ;;  %v161_v1 = vld [vmem:[%s667_s15 + $0x1] sm:$0x7f]  ;;  %v162_v2 = vld [vmem:[%s667_s15 + $0x9] sm:$0x7f] }
  0x24   : > { %168 = vst.msk [vmem:[%s673_s16 + $0xf] sm:$0x1] %vm166_vm0, %v576_v0  ;;  %v356_v3 = vld [vmem:[%s667_s15 + $0x10] sm:$0x7f]  ;;  %v357_v4 = vld [vmem:[%s667_s15 + $0x18] sm:$0x7f] }
  0x25   : > { %360 = vst.msk [vmem:[%s673_s16 + $0x10] sm:$0x1] %vm166_vm0, %v576_v0  ;;  %vm191_vm2 = vcmask 130048   ;;  %v363_v6 = vld [vmem:[%s667_s15 + $0x28] sm:$0xff]  ;;  %v364_v7 = vld [vmem:[%s667_s15 + $0x30] sm:$0xff]  ;;  %s392_s17 = sshll.u32 %s564_s9, 7 }
  0x26   : > { %361 = vst.msk [vmem:[%s673_s16 + $0x18] sm:$0x1] %vm166_vm0, %v576_v0  ;;  %v365_v8 = vld [vmem:[%s667_s15 + $0x38] sm:$0xff]  ;;  %v366_v9 = vld [vmem:[%s667_s15 + $0x40] sm:$0xff]  ;;  %v367_v10 = vld [vmem:[%s667_s15 + $0x48] sm:$0xff]  ;;  %s255_s23 = scalar_lea.hbm %s763_s1, %s392_s17  ;;  %s256_s9 = sshll.u32 %s673_s16, 4  ;;  %s257_s9 = int_to_ptr.vmem [resolvable:$true] %s256_s9 }
  0x27   : > { %164 = vst.msk [vmem:[%s673_s16] sm:$0x7f] %vm163_vm1, %v161_v1  ;;  %v368_v11 = vld [vmem:[%s667_s15 + $0x50] sm:$0xff]  ;;  %v369_v12 = vld [vmem:[%s667_s15 + $0x58] sm:$0xff]  ;;  %v370_v13 = vld [vmem:[%s667_s15 + $0x60] sm:$0xff]  ;;  %s258_s24 = sshll.u32 %s255_s23, 4  ;;  %s259_s24 = int_to_ptr.hbm [resolvable:$true] %s258_s24 }
  0x28   : > { %165 = vst.msk [vmem:[%s673_s16 + $0x8] sm:$0x7f] %vm163_vm1, %v162_v2  ;;  %v371_v14 = vld [vmem:[%s667_s15 + $0x68] sm:$0xff]  ;;  %v372_v15 = vld [vmem:[%s667_s15 + $0x70] sm:$0xff]  ;;  %v373_v16 = vld [vmem:[%s667_s15 + $0x78] sm:$0xff]  ;;  %s242_s25 = scalar_lea.sflag [#allocation4], %s663_s5 }
  0x29   : > { %358 = vst.msk [vmem:[%s673_s16 + $0x11] sm:$0x7f] %vm163_vm1, %v356_v3  ;;  %s504_s26 = sshra.s32 %s259_s24, 4  ;;  %s510_s30 = scalar_lea.hbm %s763_s1, 256  ;;  %s505_s26 = int_to_ptr.hbm [resolvable:$true] %s504_s26 }
  0x2a   : > { %359 = vst.msk [vmem:[%s673_s16 + $0x19] sm:$0x7f] %vm163_vm1, %v357_v4  ;;  %s506_s27 = scalar_lea.hbm %s505_s26, 128  ;;  %p511_p7 = scmp.lt.s32.totalorder %s505_s26, %s763_s1 }
  0x2b   : > { %374 = vst.msk [vmem:[%s673_s16 + $0x20] sm:$0xff] %vm191_vm2, %v362_v5  ;;  %p507_p4 = scmp.ne.s32.totalorder %s505_s26, %s506_s27  ;;  %p512_p8 = scmp.lt.s32.totalorder %s510_s30, %s506_s27 }
  0x2c   : > { %375 = vst.msk [vmem:[%s673_s16 + $0x28] sm:$0xff] %vm191_vm2, %v363_v6 }
  0x2d   : > { %376 = vst.msk [vmem:[%s673_s16 + $0x30] sm:$0xff] %vm191_vm2, %v364_v7  ;;  %p508_p5 = pnand %p507_p4, %p640_p9  ;;  %p513_p10 = por %p512_p8, %p511_p7 }
  0x2e   : > { %377 = vst.msk [vmem:[%s673_s16 + $0x38] sm:$0xff] %vm191_vm2, %v365_v8 }
  0x2f   : > { %378 = vst.msk [vmem:[%s673_s16 + $0x40] sm:$0xff] %vm191_vm2, %v366_v9  ;;  %p509_p6 = pneg %p508_p5 }
  0x30   : > { %379 = vst.msk [vmem:[%s673_s16 + $0x48] sm:$0xff] %vm191_vm2, %v367_v10 }
  0x31   : > { %380 = vst.msk [vmem:[%s673_s16 + $0x50] sm:$0xff] %vm191_vm2, %v368_v11  ;;  %p514_p13 = pnand %p513_p10, %p509_p6 }
  0x32   : > { %381 = vst.msk [vmem:[%s673_s16 + $0x58] sm:$0xff] %vm191_vm2, %v369_v12 }
  0x33   : > { %382 = vst.msk [vmem:[%s673_s16 + $0x60] sm:$0xff] %vm191_vm2, %v370_v13 }
  0x34   : > { %383 = vst.msk [vmem:[%s673_s16 + $0x68] sm:$0xff] %vm191_vm2, %v371_v14 }
  0x35   : > { %384 = vst.msk [vmem:[%s673_s16 + $0x70] sm:$0xff] %vm191_vm2, %v372_v15 }
  0x36   : > { %385 = vst.msk [vmem:[%s673_s16 + $0x78] sm:$0xff] %vm191_vm2, %v373_v16 }
  0x37   : > { %517 = shalt.err (!%p514_p13)
}
  0x38   : > { %s577_s4 = smov 128   ;;  %s578_s5 = smov 8  }
  0x39   : > { %395 = dma.vmem_to_hbm [thread:$0]  (%p640_p9), %s257_s9, 2048, %s259_s24, %s242_s25, %s577_s4, %s577_s4, %s578_s5  }
  0x3a PF: > { %s273_s12 = sand.u32 1, %s552_s6   ;;  %p402_p0 = pnand %p349_p12, %p647_p11 }
  0x3b   : > { %s274_s13 = scalar_lea.sflag [#allocation4], %s273_s12 }
  0x3c   : > { %p403_p1 = pneg %p402_p0 }
  0x3e   : > { %547 = dma.done.wait (%p403_p1), %s274_s13, 2048  }
  0x3f   : > { %549 = vsyncadd (%p403_p1), %s274_s13, 4294965248  ;;  %s17_s11 = sadd.s32 1, %s572_s11   ;;  %s768_s6 = smov %s556_s7 }
  0x40   : > { %p14_p2 = scmp.ge.s32.totalorder %s17_s11, 4   ;;  %s769_s7 = smov %s560_s8 }
  0x41   : > { %s770_s8 = smov %s645_s20  ;;  %s771_s9 = smov %s568_s10 }
  0x42   : > { %s772_s10 = smov %s774_s14  ;;  %16 = sbr.rel (!%p14_p2) target bundleno = 6 (0x6), region = 81 }
  0x47   :  { %280 = vsyncpa [#allocation3], 1 }
  0x48   :  { %282 = vsyncpa [#allocation3 + $0x1], 1 }
  0x49   :  { %283 = vsyncpa [#allocation4], 1 }
  0x4a   :  { %285 = vsyncpa [#allocation4 + $0x1], 1 }

</bundles_post_ra>
